<compile_context>
chip_gen: v7x
topology: tpu7x:2x2x1
jax: 0.10.0
libtpu: 0.0.40
codegen_flags: <defaults>
</compile_context>

<pallas_src>
import functools
import math

import jax
import jax.numpy as jnp
from jax.experimental import pallas as pl
from jax.experimental.pallas import tpu as pltpu


def _dqn_kernel(x_ref, w1_ref, b1_ref, w2_ref, b2_ref, o_ref, *, matmul_dtype):
    """One batch tile per grid step: relu(x @ W1 + b1) @ W2 + b2."""
    x = x_ref[...].astype(matmul_dtype)                          # (TB, S)
    w1 = w1_ref[...].astype(matmul_dtype)                        # (S, H)
    h = jnp.dot(x, w1, preferred_element_type=jnp.float32)       # MXU, f32 acc
    h = jnp.maximum(h + b1_ref[...], 0.0)                        # bias + ReLU (VPU, f32)
    w2 = w2_ref[...].astype(matmul_dtype)                        # (H, A)
    q = jnp.dot(h.astype(matmul_dtype), w2,
                preferred_element_type=jnp.float32)              # MXU, f32 acc
    o_ref[...] = (q + b2_ref[...]).astype(o_ref.dtype)


def dqn_forward(x, w1, b1, w2, b2, *, block_b=1024, matmul_dtype=jnp.float32):
    """Forward pass of DQN: relu(x @ w1 + b1) @ w2 + b2.

    x : (B, state_dim) or (state_dim,) float32
    w1: (state_dim, hidden_dim),  b1: (1, hidden_dim)
    w2: (hidden_dim, action_dim), b2: (1, action_dim)
    Returns (B, action_dim) (or (action_dim,) for 1-D input), like nn.Linear.
    """
    squeeze_out = x.ndim == 1
    if squeeze_out:
        x = x[None, :]

    B, S = x.shape
    H = w1.shape[1]
    A = w2.shape[1]

    # Batch tiling. Small batch -> one full-array step (block == full dims, so no
    # (8,128) divisibility constraint and no padding: wrapper == one pallas_call).
    # Large batch -> TB = block_b rows/step (multiple of 8 on the sublane axis);
    # pad the batch up to a multiple of TB so every block is in-bounds.
    block_b = max(8, (block_b // 8) * 8)
    if B <= block_b:
        tb = B
        b_padded = B
    else:
        tb = block_b
        b_padded = pl.cdiv(B, tb) * tb
    if b_padded != B:
        x = jnp.pad(x, ((0, b_padded - B), (0, 0)))

    grid = (b_padded // tb,)

    flops = 2 * b_padded * (S * H + H * A)
    bytes_accessed = 4 * (b_padded * S + S * H + H + H * A + A + b_padded * A)

    kernel = functools.partial(_dqn_kernel, matmul_dtype=matmul_dtype)

    out = pl.pallas_call(
        kernel,
        out_shape=jax.ShapeDtypeStruct((b_padded, A), jnp.float32),
        grid_spec=pltpu.PrefetchScalarGridSpec(
            num_scalar_prefetch=0,
            grid=grid,
            in_specs=[
                # activations: tiled over batch
                pl.BlockSpec((tb, S), lambda i: (i, 0)),
                # parameters: constant block index -> fetched once, VMEM-resident
                pl.BlockSpec((S, H), lambda i: (0, 0)),
                pl.BlockSpec((1, H), lambda i: (0, 0)),
                pl.BlockSpec((H, A), lambda i: (0, 0)),
                pl.BlockSpec((1, A), lambda i: (0, 0)),
            ],
            out_specs=pl.BlockSpec((tb, A), lambda i: (i, 0)),
        ),
        compiler_params=pltpu.CompilerParams(
            # batch steps are independent -> megacore sharding on v7x
            dimension_semantics=("parallel",),
        ),
        cost_estimate=pl.CostEstimate(
            flops=flops, transcendentals=0, bytes_accessed=bytes_accessed),
    )(x, w1, b1, w2, b2)

    if b_padded != B:
        out = out[:B]
    if squeeze_out:
        out = out[0]
    return out


def init_dqn_params(key, state_dim, action_dim, hidden_dim=64):
    """Deterministic init mimicking nn.Linear's U(-1/sqrt(fan_in), 1/sqrt(fan_in)).

    PyTorch stores weights as (out, in); they are transposed ONCE here to the
    (in, out) layout the kernel consumes, so no per-call transposes are needed.
    """
    k1, k2, k3, k4 = jax.random.split(key, 4)
    bound1 = 1.0 / math.sqrt(state_dim)
    bound2 = 1.0 / math.sqrt(hidden_dim)
    w1_pt = jax.random.uniform(k1, (hidden_dim, state_dim), jnp.float32,
                               -bound1, bound1)
    b1 = jax.random.uniform(k2, (1, hidden_dim), jnp.float32, -bound1, bound1)
    w2_pt = jax.random.uniform(k3, (action_dim, hidden_dim), jnp.float32,
                               -bound2, bound2)
    b2 = jax.random.uniform(k4, (1, action_dim), jnp.float32, -bound2, bound2)
    return w1_pt.T, b1, w2_pt.T, b2


def _reference(x, w1, b1, w2, b2):
    return jnp.maximum(x @ w1 + b1, 0.0) @ w2 + b2


if __name__ == "__main__":
    key = jax.random.PRNGKey(0)
    kx, kp, kb, ka = jax.random.split(key, 4)

    batch = 2
    state_dim = 8
    action_dim = 4
    hidden_dim = 64

    w1, b1, w2, b2 = init_dqn_params(kp, state_dim, action_dim, hidden_dim)

    # --- small-batch path (single full-array grid step, typical learn() batch) ---
    x_small = jax.random.normal(kx, (batch, state_dim), jnp.float32)
    q_small = dqn_forward(x_small, w1, b1, w2, b2)
    jax.block_until_ready(q_small)
    assert q_small.shape == (batch, action_dim)
    assert jnp.allclose(q_small, _reference(x_small, w1, b1, w2, b2),
                        atol=1e-4, rtol=1e-4)

    # --- act() path: single state vector, nn.Linear-style 1-D input ---
    x_act = jax.random.normal(ka, (state_dim,), jnp.float32)
    q_act = dqn_forward(x_act, w1, b1, w2, b2)
    jax.block_until_ready(q_act)
    assert q_act.shape == (action_dim,)
    assert jnp.allclose(q_act, _reference(x_act[None, :], w1, b1, w2, b2)[0],
                        atol=1e-4, rtol=1e-4)

    # --- huge replay-batch path (multi-step batch grid + padding, tb=256) ---
    big_batch = 1000  # non-multiple of the tile to exercise the padded path
    x_big = jax.random.normal(kb, (big_batch, state_dim), jnp.float32)
    q_big = dqn_forward(x_big, w1, b1, w2, b2, block_b=256)
    jax.block_until_ready(q_big)
    assert q_big.shape == (big_batch, action_dim)
    assert jnp.allclose(q_big, _reference(x_big, w1, b1, w2, b2),
                        atol=1e-4, rtol=1e-4)

    print("KERNEL_OK")
</pallas_src>

<mosaic_0001>
module attributes {stable_mosaic.version = 11 : i64} {
  func.func @_dqn_kernel(%arg0: i32, %arg1: memref<2x8xf32, #tpu.memory_space<vmem>>, %arg2: memref<8x64xf32, #tpu.memory_space<vmem>>, %arg3: memref<1x64xf32, #tpu.memory_space<vmem>>, %arg4: memref<64x4xf32, #tpu.memory_space<vmem>>, %arg5: memref<1x4xf32, #tpu.memory_space<vmem>>, %arg6: memref<2x4xf32, #tpu.memory_space<vmem>>) attributes {dimension_semantics = [#tpu.dimension_semantics<parallel>], iteration_bounds = array<i64: 1>, scalar_prefetch = 0 : i64, scratch_operands = 0 : i64, tpu.core_type = #tpu.core_type<tc>, window_params = [{transform_indices = @transform_0, window_bounds = array<i64: 2, 8>}, {pipeline_mode = #tpu.pipeline_mode<synchronous>, transform_indices = @transform_1, window_bounds = array<i64: 8, 64>}, {pipeline_mode = #tpu.pipeline_mode<synchronous>, transform_indices = @transform_2, window_bounds = array<i64: 1, 64>}, {pipeline_mode = #tpu.pipeline_mode<synchronous>, transform_indices = @transform_3, window_bounds = array<i64: 64, 4>}, {pipeline_mode = #tpu.pipeline_mode<synchronous>, transform_indices = @transform_4, window_bounds = array<i64: 1, 4>}, {transform_indices = @transform_5, window_bounds = array<i64: 2, 4>}]} {
    %c0 = arith.constant 0 : index
    %c0_0 = arith.constant 0 : index
    %0 = vector.load %arg1[%c0, %c0_0] : memref<2x8xf32, #tpu.memory_space<vmem>>, vector<2x8xf32>
    %c0_1 = arith.constant 0 : index
    %c0_2 = arith.constant 0 : index
    %1 = vector.load %arg2[%c0_1, %c0_2] : memref<8x64xf32, #tpu.memory_space<vmem>>, vector<8x64xf32>
    %cst = arith.constant dense<0.000000e+00> : vector<2x64xf32>
    %2 = tpu.matmul %0, %1, %cst {dimension_numbers = #tpu.dot_dimension_numbers<[1], [0], [0], [1], [0, 0, 1, 1], [], []>} : vector<2x8xf32>, vector<8x64xf32>, vector<2x64xf32> -> vector<2x64xf32>
    %c0_3 = arith.constant 0 : index
    %c0_4 = arith.constant 0 : index
    %3 = vector.load %arg3[%c0_3, %c0_4] : memref<1x64xf32, #tpu.memory_space<vmem>>, vector<1x64xf32>
    %4 = vector.broadcast %3 : vector<1x64xf32> to vector<2x64xf32>
    %5 = arith.addf %2, %4 : vector<2x64xf32>
    %cst_5 = arith.constant 0.000000e+00 : f32
    %6 = vector.broadcast %cst_5 : f32 to vector<2x64xf32>
    %7 = arith.maximumf %5, %6 : vector<2x64xf32>
    %c0_6 = arith.constant 0 : index
    %c0_7 = arith.constant 0 : index
    %8 = vector.load %arg4[%c0_6, %c0_7] : memref<64x4xf32, #tpu.memory_space<vmem>>, vector<64x4xf32>
    %cst_8 = arith.constant dense<0.000000e+00> : vector<2x4xf32>
    %9 = tpu.matmul %7, %8, %cst_8 {dimension_numbers = #tpu.dot_dimension_numbers<[1], [0], [0], [1], [0, 0, 1, 1], [], []>} : vector<2x64xf32>, vector<64x4xf32>, vector<2x4xf32> -> vector<2x4xf32>
    %c0_9 = arith.constant 0 : index
    %c0_10 = arith.constant 0 : index
    %10 = vector.load %arg5[%c0_9, %c0_10] : memref<1x4xf32, #tpu.memory_space<vmem>>, vector<1x4xf32>
    %11 = vector.broadcast %10 : vector<1x4xf32> to vector<2x4xf32>
    %12 = arith.addf %9, %11 : vector<2x4xf32>
    %c0_11 = arith.constant 0 : index
    %c0_12 = arith.constant 0 : index
    %13 = vector.load %arg6[%c0_11, %c0_12] : memref<2x4xf32, #tpu.memory_space<vmem>>, vector<2x4xf32>
    tpu.vector_store %arg6[%c0_11, %c0_12], %12 {strides = array<i32>} : memref<2x4xf32, #tpu.memory_space<vmem>>, vector<2x4xf32>,
    return
  }
  func.func @transform_0(%arg0: i32) -> (i32, i32) {
    %c0_i32 = arith.constant 0 : i32
    %c0_i32_0 = arith.constant 0 : i32
    return %arg0, %c0_i32 : i32, i32
  }
  func.func @transform_1(%arg0: i32) -> (i32, i32) {
    %c0_i32 = arith.constant 0 : i32
    %c0_i32_0 = arith.constant 0 : i32
    %c0_i32_1 = arith.constant 0 : i32
    return %c0_i32, %c0_i32_0 : i32, i32
  }
  func.func @transform_2(%arg0: i32) -> (i32, i32) {
    %c0_i32 = arith.constant 0 : i32
    %c0_i32_0 = arith.constant 0 : i32
    %c0_i32_1 = arith.constant 0 : i32
    return %c0_i32, %c0_i32_0 : i32, i32
  }
  func.func @transform_3(%arg0: i32) -> (i32, i32) {
    %c0_i32 = arith.constant 0 : i32
    %c0_i32_0 = arith.constant 0 : i32
    %c0_i32_1 = arith.constant 0 : i32
    return %c0_i32, %c0_i32_0 : i32, i32
  }
  func.func @transform_4(%arg0: i32) -> (i32, i32) {
    %c0_i32 = arith.constant 0 : i32
    %c0_i32_0 = arith.constant 0 : i32
    %c0_i32_1 = arith.constant 0 : i32
    return %c0_i32, %c0_i32_0 : i32, i32
  }
  func.func @transform_5(%arg0: i32) -> (i32, i32) {
    %c0_i32 = arith.constant 0 : i32
    %c0_i32_0 = arith.constant 0 : i32
    return %arg0, %c0_i32 : i32, i32
  }
}

</mosaic_0001>

<bundles_post_ra>
// kernel: tpu_custom_call.1
= control target key start
LH: loop header
LB: loop body
LE: loop exit
PB: predicated region body
PF: predicated region fallthrough
CT: control target
= control target key end

     0   :  { %vm30_vm0 = vcmask 64512   ;;  %v289_v2 = vmov 0.0   ;;  %vm290_vm1 = vmmov 0   ;;  %v291_v6 = vmov 0.0|0.0   ;;  %s371_s0 = inlined_call_operand.vmem [shape: f32[2,8], index: 0, kind: input, shape index: {}]   ;;  %s372_s1 = inlined_call_operand.vmem [shape: f32[8,64], index: 1, kind: input, shape index: {}]   ;;  %s373_s2 = inlined_call_operand.vmem [shape: f32[1,64], index: 2, kind: input, shape index: {}]   ;;  %s374_s3 = inlined_call_operand.vmem [shape: f32[64,4], index: 3, kind: input, shape index: {}]   ;;  %s375_s4 = inlined_call_operand.vmem [shape: f32[1,4], index: 4, kind: input, shape index: {}]   ;;  %s376_s5 = inlined_call_operand.hbm [shape: f32[2,4], index: 5, kind: output, shape index: {}]  }
   0x1   :  { %v22_v0 = vld [vmem:[%s372_s1] sm:$0xff]  ;;  %225 = vmatprep.subr.mxu0 %v289_v2  ;;  %227 = vmatprep.mubr.msk.f32.mxu0 %vm290_vm1, %v289_v2  ;;  %v106_v4 = vld [vmem:[%s374_s3 + $0x8] sm:$0xff]  ;;  %v107_v5 = vld [vmem:[%s374_s3 + $0x10] sm:$0xff] }
   0x2   :  { %v21_v1 = vld [vmem:[%s371_s0] sm:$0x3]  ;;  %226 = vmatpush3.msra.mxu0 %v22_v0  ;;  %249 = vmatprep.subr.bf16.mxu1 %v291_v6  ;;  %v108_v8 = vld [vmem:[%s374_s3 + $0x18] sm:$0xff] }
   0x3   :  { %v105_v3 = vld [vmem:[%s374_s3] sm:$0xff]  ;;  %228 = vmatmul.mubr.msk.f32.vlgmr.msra.gmra.mrb[0].mxu0 %vm30_vm0, %v21_v1  ;;  %246 = vmatprep.mubr.msk.f32.mxu1 %vm290_vm1, %v289_v2 }
   0x4   :  { %v250_v7 = vpack.c.bf16 %v106_v4, %v105_v3 }
   0x5   :  { %10 = vsyncpa [#allocation3], 0  ;;  %v253_v9 = vpack.c.bf16 %v108_v8, %v107_v5  ;;  %v109_v10 = vld [vmem:[%s374_s3 + $0x20] sm:$0xff]  ;;  %v110_v11 = vld [vmem:[%s374_s3 + $0x28] sm:$0xff]  ;;  %vm120_vm2 = vcmask 523264   ;;  %s292_s15 = smov [#allocation2]  }
   0x6   :  { %251 = vmatpush3.bf16.msra.mxu1 %v250_v7  ;;  %v256_v12 = vpack.c.bf16 %v110_v11, %v109_v10  ;;  %v111_v13 = vld [vmem:[%s374_s3 + $0x30] sm:$0xff]  ;;  %v112_v14 = vld [vmem:[%s374_s3 + $0x38] sm:$0xff]  ;;  %v210_v16 = vld [vmem:[%s373_s2] ss:$0 sm:$0xff]  ;;  %s202_s16 = sshll.u32 %s292_s15, 4  ;;  %vm194_vm3 = vcmask 25600   ;;  %s203_s16 = int_to_ptr.vmem [resolvable:$true] %s202_s16 }
   0x7   :  { %252 = vmatprep.subr.bf16.mxu1 %v291_v6  ;;  %v259_v15 = vpack.c.bf16 %v112_v14, %v111_v13  ;;  %v212_v21 = vld [vmem:[%s375_s4] ss:$0 sm:$0xff]  ;;  %s265_s3 = scalar_lea.vmem %s203_s16, 32  ;;  %p270_p1 = scmp.lt.s32.totalorder %s203_s16, %s203_s16 }
   0x8   :  { %p266_p0 = scmp.ne.s32.totalorder %s203_s16, %s265_s3  ;;  %p271_p2 = scmp.lt.s32.totalorder %s265_s3, %s265_s3 }
   0xa   :  { %254 = vmatpush3.bf16.msra.mxu1 %v253_v9  ;;  %p272_p3 = por %p271_p2, %p270_p1 }
   0xb   :  { %255 = vmatprep.subr.bf16.mxu1 %v291_v6 }
   0xc   :  { %p273_p4 = pnand %p272_p3, %p266_p0 }
   0xe   :  { %257 = vmatpush3.bf16.msra.mxu1 %v256_v12 }
   0xf   :  { %258 = vmatprep.subr.bf16.mxu1 %v291_v6 }
  0x12   :  { %260 = vmatpush3.bf16.msra.mxu1 %v259_v15 }
  0xd6   :  { %v100_v17 = vpop.f32.mrb[0].mxu0 }
  0xd7   :  { %v101_v18 = vadd.f32 %v210_v16, %v100_v17  ;;  %v229_v19 = vpop.f32.mrb[1].mxu0 }
  0xd9   :  { %v104_v20 = vmax.f32 %v101_v18, 0.0 }
  0xdb   :  { %247 = vmatmul.mubr.msk.f32.vlgmr.msra.gmra.mrb[0].mxu1 %vm120_vm2, %v104_v20 }
 0x1ae   :  { %v190_v22 = vpop.f32.mrb[0].mxu1 }
 0x1af   :  { %v191_v23 = vadd.f32 %v212_v21, %v190_v22  ;;  %v248_v24 = vpop.f32.mrb[1].mxu1 }
 0x1b1   :  { %195 = vst.msk [vmem:[#allocation2] sm:$0x3] %vm194_vm3, %v191_v23 }
 0x1b2   :  { %276 = shalt.err (!%p273_p4)
}
 0x1b3   :  { %s277_s18 = scalar_lea.hbm %s376_s5, 32 }
 0x1b4   :  { %p278_p5 = scmp.ne.s32.totalorder %s376_s5, %s277_s18  ;;  %p281_p6 = scmp.lt.u32.totalorder %s277_s18, %s376_s5 }
 0x1b6   :  { %p283_p7 = pnand %p281_p6, %p278_p5 }
 0x1b8   :  { %286 = shalt.err (!%p283_p7)
}
 0x1b9   :  { %205 = dma.vmem_to_hbm [thread:$0]  %s203_s16, 32, %s376_s5, [#allocation3]  }
 0x1ba   :  { %287 = dma.done.wait [#allocation3], 32  }
 0x1bb   :  { %288 = vsyncadd [#allocation3], 4294967264 }
 0x1bc   :  { %209 = vsyncpa [#allocation3], 1 }

</bundles_post_ra>
